<compile_context>
chip_gen: v7x
topology: tpu7x:2x2x1
jax: 0.10.0
libtpu: 0.0.40
codegen_flags: <defaults>
</compile_context>

<pallas_src>
import jax
import jax.numpy as jnp
from jax.experimental import pallas as pl
from jax.experimental.pallas import tpu as pltpu


def _round_up(x, m):
    return ((x + m - 1) // m) * m


def make_pm25cnn_kernel(hidden_layer, R, TB, GF, GHd):
    n_rest = hidden_layer - 1

    def kernel(*refs):
        if n_rest > 0:
            (x_ref, w0_ref, b0_ref, wr_ref, br_ref, fcw_ref, beta_ref, o_ref) = refs
        else:
            (x_ref, w0_ref, b0_ref, fcw_ref, beta_ref, o_ref) = refs
            wr_ref = br_ref = None

        # ---- pointwise conv stack over all (position-group, sample) rows -------
        # x block is (R, TB, G*F) bf16; merging the leading dims is layout-free
        # because TB is a sublane-tile multiple.  One MXU matmul per layer
        # (bf16 operands, f32 accumulate); bias/ReLU stay in f32 on the VPU.
        h = x_ref[...].reshape(R * TB, GF)
        h = jnp.dot(h, w0_ref[...], preferred_element_type=jnp.float32) + b0_ref[...]
        h = jnp.maximum(h, 0.0)
        for i in range(1, hidden_layer):
            h = jnp.dot(h.astype(jnp.bfloat16), wr_ref[i - 1],
                        preferred_element_type=jnp.float32) + br_ref[i - 1]
            h = jnp.maximum(h, 0.0)

        # TODO(synk): nn.Dropout is identity in eval mode; no stochastic masking here.

        # ---- sum over position groups: rows are ordered r-major / sample-minor,
        # so this is R-1 plain vector adds over (TB, G*Hd) slabs (no relayout,
        # no masking — the zero alignment rows are corrected analytically in beta).
        hsum = h[0:TB, :]
        for r in range(1, R):
            hsum = hsum + h[r * TB:(r + 1) * TB, :]

        # ---- final Linear(hidden_size, 1): fcw_ref already carries the G-tiled
        # fc weight scaled by 1/L_final (8 identical sublanes).  Contract over the
        # lane dim with the samples landing in the OUTPUT lane dim -> lane-dense
        # (1, TB) store.
        rows = jax.lax.dot_general(
            fcw_ref[...], hsum,
            dimension_numbers=(((1,), (1,)), ((), ())),
            preferred_element_type=jnp.float32)          # (8, TB), rows identical
        o_ref[0] = rows[0:1, :] + beta_ref[...]          # beta: edges + pad + fc_b

    return kernel


def pm25cnn_forward(x_ncl, w0, b0, w_rest, b_rest, fc_w, fc_b, hidden_layer,
                    *, block_n=512):
    """x_ncl: (N, n_features, L) — same convention as the PyTorch module.

    w0: (F, Hd), b0: (Hd,), w_rest: (hidden_layer-1, Hd, Hd), b_rest: (.., Hd),
    fc_w: (Hd, 1), fc_b: (1,).  (PyTorch Conv1d stores (C_out, C_in, 1); transpose
    + squeeze to this (C_in, C_out) convention when importing a state_dict.)
    """
    N, F, L = x_ncl.shape
    Hd = w0.shape[1]
    n_rest = hidden_layer - 1
    L_final = L + 2 * hidden_layer          # grown length after the conv stack

    # Lane-packing factor: pack G consecutive positions so hidden activations use
    # G*Hd lanes (a full 128-lane vreg when Hd divides 128).
    G = (128 // Hd) if (Hd <= 128 and 128 % Hd == 0) else 1
    L_pad = _round_up(L, G)                 # only divisibility by G is needed
    R = L_pad // G
    GF, GHd = G * F, G * Hd

    # ---- batch-invariant edge terms (f32, once, in the wrapper) ---------------
    # kernel_size == 1 => positions never mix, so the pair of zero columns added
    # before layer i becomes ReLU(b_i) and then flows through layers i+1.. .  The
    # (L_pad - L) zero alignment rows behave exactly like the i = 0 term.
    edge_terms = []
    for i in range(hidden_layer):
        e = jnp.maximum((b0 if i == 0 else b_rest[i - 1]).astype(jnp.float32), 0.0)
        for j in range(i + 1, hidden_layer):
            e = jnp.maximum(e @ w_rest[j - 1].astype(jnp.float32)
                            + b_rest[j - 1].astype(jnp.float32), 0.0)
        edge_terms.append(e)
    adj = 2.0 * sum(edge_terms) - float(L_pad - L) * edge_terms[0]       # (Hd,)
    beta = (adj @ fc_w.reshape(Hd).astype(jnp.float32) / L_final
            + fc_b.reshape(()).astype(jnp.float32)).reshape(1, 1).astype(jnp.float32)

    # ---- tile size: samples per grid step (multiple of 128 => lane-dense out,
    # clean layouts); cap the per-step matmul rows to bound VMEM scratch ----------
    rows_cap = 8192
    tb_cap = max(128, (rows_cap // R) // 128 * 128)
    TB = min(_round_up(block_n, 128), _round_up(N, 128), tb_cap)
    N_pad = _round_up(N, TB)
    n_steps = N_pad // TB

    # ---- pack x: (N, F, L) -> (R, N_pad, G*F) bf16 -----------------------------
    x_nlf = jnp.transpose(x_ncl, (0, 2, 1))                              # (N, L, F)
    x_nlf = jnp.pad(x_nlf, ((0, N_pad - N), (0, L_pad - L), (0, 0)))
    x_pk = (x_nlf.reshape(N_pad, R, G, F)
            .transpose(1, 0, 2, 3)
            .reshape(R, N_pad, GF)
            .astype(jnp.bfloat16))

    # ---- block-diagonal (kron) weights + tiled biases / scaled fc row ----------
    eye_g = jnp.eye(G, dtype=jnp.float32)
    w0_bd = jnp.kron(eye_g, w0.astype(jnp.float32)).astype(jnp.bfloat16)  # (GF, GHd)
    b0_t = jnp.tile(b0.astype(jnp.float32), G).reshape(1, GHd)
    fcw_t = jnp.broadcast_to(
        (jnp.tile(fc_w.reshape(Hd).astype(jnp.float32), G) / L_final)[None, :],
        (8, GHd)).astype(jnp.float32)

    args = [x_pk, w0_bd, b0_t]
    in_specs = [
        pl.BlockSpec((R, TB, GF), lambda n: (0, n, 0)),      # packed x (bf16)
        pl.BlockSpec((GF, GHd), lambda n: (0, 0)),           # blockdiag W0 (bf16)
        pl.BlockSpec((1, GHd), lambda n: (0, 0)),            # tiled b0 (f32)
    ]
    if n_rest > 0:                                           # deeper layers only
        wr_bd = jnp.stack([jnp.kron(eye_g, w_rest[i].astype(jnp.float32))
                           for i in range(n_rest)]).astype(jnp.bfloat16)
        br_t = jnp.stack([jnp.tile(b_rest[i].astype(jnp.float32), G)
                          for i in range(n_rest)]).reshape(n_rest, 1, GHd)
        args += [wr_bd, br_t]
        in_specs += [pl.BlockSpec((n_rest, GHd, GHd), lambda n: (0, 0, 0)),
                     pl.BlockSpec((n_rest, 1, GHd), lambda n: (0, 0, 0))]
    args += [fcw_t, beta]
    in_specs += [pl.BlockSpec((8, GHd), lambda n: (0, 0)),   # fc row * (1/L_final)
                 pl.BlockSpec((1, 1), lambda n: (0, 0))]     # edges/pad + fc bias

    kernel = make_pm25cnn_kernel(hidden_layer, R, TB, GF, GHd)

    flops = (2 * N_pad * L_pad * F * GHd                     # layer 0 (packed)
             + 2 * n_rest * N_pad * L_pad * G * Hd * Hd      # layers 1..
             + 2 * N_pad * GHd)                              # final fc
    bytes_accessed = (x_pk.size * 2 + N_pad * 4 + w0_bd.size * 2
                      + (n_rest * GHd * GHd * 2 if n_rest > 0 else 0))

    out = pl.pallas_call(
        kernel,
        out_shape=jax.ShapeDtypeStruct((n_steps, 1, TB), jnp.float32),
        grid_spec=pltpu.PrefetchScalarGridSpec(
            num_scalar_prefetch=0,
            grid=(n_steps,),
            in_specs=in_specs,
            out_specs=pl.BlockSpec((1, 1, TB), lambda n: (n, 0, 0)),
        ),
        compiler_params=pltpu.CompilerParams(
            dimension_semantics=("parallel",),
            vmem_limit_bytes=64 * 1024 * 1024),
        cost_estimate=pl.CostEstimate(flops=int(flops), transcendentals=0,
                                      bytes_accessed=int(bytes_accessed)),
    )(*args)
    return out.reshape(N_pad)[:N].reshape(N, 1)


def pm25cnn_reference(x_ncl, w0, b0, w_rest, b_rest, fc_w, fc_b, hidden_layer):
    """Pure-JAX f32 reference matching the PyTorch forward (eval mode)."""
    h = x_ncl
    for i in range(hidden_layer):
        h = jnp.pad(h, ((0, 0), (0, 0), (1, 1)))          # Conv1d padding=1
        w = w0 if i == 0 else w_rest[i - 1]               # (C_in, C_out)
        b = b0 if i == 0 else b_rest[i - 1]               # (C_out,)
        h = jnp.einsum('io,nil->nol', w, h) + b[None, :, None]
        h = jnp.maximum(h, 0.0)
    m = jnp.mean(h, axis=2)                               # torch.mean(x, dim=2)
    return m @ fc_w + fc_b[None, :]                       # Linear(hidden_size, 1)


if __name__ == "__main__":
    # Module hyperparameters (small, consistent with the forward pass).
    n_features = 4
    hidden_layer = 2
    hidden_size = 32
    # drop_out = 0.1  # identity in eval mode

    N, L = 2, 16

    key = jax.random.PRNGKey(0)
    k_x, k_w0, k_b0, k_wr, k_br, k_fw, k_fb = jax.random.split(key, 7)

    x = jax.random.normal(k_x, (N, n_features, L), jnp.float32)

    n_rest = hidden_layer - 1
    w0 = 0.1 * jax.random.normal(k_w0, (n_features, hidden_size), jnp.float32)
    b0 = 0.1 * jax.random.normal(k_b0, (hidden_size,), jnp.float32)
    w_rest = 0.1 * jax.random.normal(k_wr, (n_rest, hidden_size, hidden_size), jnp.float32)
    b_rest = 0.1 * jax.random.normal(k_br, (n_rest, hidden_size), jnp.float32)
    fc_w = 0.1 * jax.random.normal(k_fw, (hidden_size, 1), jnp.float32)
    fc_b = 0.1 * jax.random.normal(k_fb, (1,), jnp.float32)

    out = pm25cnn_forward(x, w0, b0, w_rest, b_rest, fc_w, fc_b, hidden_layer)
    out = jax.block_until_ready(out)

    ref = pm25cnn_reference(x, w0, b0, w_rest, b_rest, fc_w, fc_b, hidden_layer)
    assert out.shape == (N, 1)
    # Kernel uses bf16 MXU operands (f32 accumulate/elementwise); compare with a
    # tolerance that covers bf16 operand quantization.
    assert jnp.allclose(out, ref, atol=1e-2, rtol=2e-2), (out, ref)

    print("KERNEL_OK")
</pallas_src>

<mosaic_0001>
module attributes {stable_mosaic.version = 11 : i64} {
  func.func @kernel(%arg0: i32, %arg1: memref<4x128x16xbf16, #tpu.memory_space<vmem>>, %arg2: memref<16x128xbf16, #tpu.memory_space<vmem>>, %arg3: memref<1x128xf32, #tpu.memory_space<vmem>>, %arg4: memref<1x128x128xbf16, #tpu.memory_space<vmem>>, %arg5: memref<1x1x128xf32, #tpu.memory_space<vmem>>, %arg6: memref<8x128xf32, #tpu.memory_space<vmem>>, %arg7: memref<1x1xf32, #tpu.memory_space<vmem>>, %arg8: memref<1x1x128xf32, #tpu.memory_space<vmem>>) attributes {dimension_semantics = [#tpu.dimension_semantics<parallel>], iteration_bounds = array<i64: 1>, scalar_prefetch = 0 : i64, scratch_operands = 0 : i64, tpu.core_type = #tpu.core_type<tc>, window_params = [{transform_indices = @transform_0, window_bounds = array<i64: 4, 128, 16>}, {pipeline_mode = #tpu.pipeline_mode<synchronous>, transform_indices = @transform_1, window_bounds = array<i64: 16, 128>}, {pipeline_mode = #tpu.pipeline_mode<synchronous>, transform_indices = @transform_2, window_bounds = array<i64: 1, 128>}, {pipeline_mode = #tpu.pipeline_mode<synchronous>, transform_indices = @transform_3, window_bounds = array<i64: 1, 128, 128>}, {pipeline_mode = #tpu.pipeline_mode<synchronous>, transform_indices = @transform_4, window_bounds = array<i64: 1, 1, 128>}, {pipeline_mode = #tpu.pipeline_mode<synchronous>, transform_indices = @transform_5, window_bounds = array<i64: 8, 128>}, {pipeline_mode = #tpu.pipeline_mode<synchronous>, transform_indices = @transform_6, window_bounds = array<i64: 1, 1>}, {transform_indices = @transform_7, window_bounds = array<i64: 1, 1, 128>}]} {
    %c0 = arith.constant 0 : index
    %c0_0 = arith.constant 0 : index
    %c0_1 = arith.constant 0 : index
    %0 = vector.load %arg1[%c0, %c0_0, %c0_1] : memref<4x128x16xbf16, #tpu.memory_space<vmem>>, vector<4x128x16xbf16>
    %1 = vector.shape_cast %0 : vector<4x128x16xbf16> to vector<512x16xbf16>
    %c0_2 = arith.constant 0 : index
    %c0_3 = arith.constant 0 : index
    %2 = vector.load %arg2[%c0_2, %c0_3] : memref<16x128xbf16, #tpu.memory_space<vmem>>, vector<16x128xbf16>
    %cst = arith.constant dense<0.000000e+00> : vector<512x128xf32>
    %3 = tpu.matmul %1, %2, %cst {dimension_numbers = #tpu.dot_dimension_numbers<[1], [0], [0], [1], [0, 0, 1, 1], [], []>} : vector<512x16xbf16>, vector<16x128xbf16>, vector<512x128xf32> -> vector<512x128xf32>
    %c0_4 = arith.constant 0 : index
    %c0_5 = arith.constant 0 : index
    %4 = vector.load %arg3[%c0_4, %c0_5] : memref<1x128xf32, #tpu.memory_space<vmem>>, vector<1x128xf32>
    %5 = vector.broadcast %4 : vector<1x128xf32> to vector<512x128xf32>
    %6 = arith.addf %3, %5 : vector<512x128xf32>
    %cst_6 = arith.constant 0.000000e+00 : f32
    %7 = vector.broadcast %cst_6 : f32 to vector<512x128xf32>
    %8 = arith.maximumf %6, %7 : vector<512x128xf32>
    %9 = arith.truncf %8 : vector<512x128xf32> to vector<512x128xbf16>
    %c0_7 = arith.constant 0 : index
    %c0_8 = arith.constant 0 : index
    %c0_9 = arith.constant 0 : index
    %10 = vector.load %arg4[%c0_7, %c0_8, %c0_9] : memref<1x128x128xbf16, #tpu.memory_space<vmem>>, vector<1x128x128xbf16>
    %11 = vector.shape_cast %10 : vector<1x128x128xbf16> to vector<128x128xbf16>
    %cst_10 = arith.constant dense<0.000000e+00> : vector<512x128xf32>
    %12 = tpu.matmul %9, %11, %cst_10 {dimension_numbers = #tpu.dot_dimension_numbers<[1], [0], [0], [1], [0, 0, 1, 1], [], []>} : vector<512x128xbf16>, vector<128x128xbf16>, vector<512x128xf32> -> vector<512x128xf32>
    %c0_11 = arith.constant 0 : index
    %c0_12 = arith.constant 0 : index
    %c0_13 = arith.constant 0 : index
    %13 = vector.load %arg5[%c0_11, %c0_12, %c0_13] : memref<1x1x128xf32, #tpu.memory_space<vmem>>, vector<1x1x128xf32>
    %14 = vector.shape_cast %13 : vector<1x1x128xf32> to vector<1x128xf32>
    %15 = vector.broadcast %14 : vector<1x128xf32> to vector<512x128xf32>
    %16 = arith.addf %12, %15 : vector<512x128xf32>
    %cst_14 = arith.constant 0.000000e+00 : f32
    %17 = vector.broadcast %cst_14 : f32 to vector<512x128xf32>
    %18 = arith.maximumf %16, %17 : vector<512x128xf32>
    %19 = vector.extract_strided_slice %18 {offsets = [0, 0], sizes = [128, 128], strides = [1, 1]} : vector<512x128xf32> to vector<128x128xf32>
    %20 = vector.extract_strided_slice %18 {offsets = [128, 0], sizes = [128, 128], strides = [1, 1]} : vector<512x128xf32> to vector<128x128xf32>
    %21 = arith.addf %19, %20 : vector<128x128xf32>
    %22 = vector.extract_strided_slice %18 {offsets = [256, 0], sizes = [128, 128], strides = [1, 1]} : vector<512x128xf32> to vector<128x128xf32>
    %23 = arith.addf %21, %22 : vector<128x128xf32>
    %24 = vector.extract_strided_slice %18 {offsets = [384, 0], sizes = [128, 128], strides = [1, 1]} : vector<512x128xf32> to vector<128x128xf32>
    %25 = arith.addf %23, %24 : vector<128x128xf32>
    %c0_15 = arith.constant 0 : index
    %c0_16 = arith.constant 0 : index
    %26 = vector.load %arg6[%c0_15, %c0_16] : memref<8x128xf32, #tpu.memory_space<vmem>>, vector<8x128xf32>
    %cst_17 = arith.constant dense<0.000000e+00> : vector<8x128xf32>
    %27 = tpu.matmul %26, %25, %cst_17 {dimension_numbers = #tpu.dot_dimension_numbers<[1], [1], [0], [0], [0, 0, 1, 0], [], []>} : vector<8x128xf32>, vector<128x128xf32>, vector<8x128xf32> -> vector<8x128xf32>
    %28 = vector.extract_strided_slice %27 {offsets = [0, 0], sizes = [1, 128], strides = [1, 1]} : vector<8x128xf32> to vector<1x128xf32>
    %c0_18 = arith.constant 0 : index
    %c0_19 = arith.constant 0 : index
    %29 = vector.load %arg7[%c0_18, %c0_19] : memref<1x1xf32, #tpu.memory_space<vmem>>, vector<1x1xf32>
    %30 = vector.broadcast %29 : vector<1x1xf32> to vector<1x128xf32>
    %31 = arith.addf %28, %30 : vector<1x128xf32>
    %c0_20 = arith.constant 0 : index
    %c0_21 = arith.constant 0 : index
    %c0_22 = arith.constant 0 : index
    %32 = vector.load %arg8[%c0_20, %c0_21, %c0_22] : memref<1x1x128xf32, #tpu.memory_space<vmem>>, vector<1x1x128xf32>
    %33 = vector.shape_cast %32 : vector<1x1x128xf32> to vector<1x128xf32>
    %34 = vector.shape_cast %31 : vector<1x128xf32> to vector<1x1x128xf32>
    tpu.vector_store %arg8[%c0_20, %c0_21, %c0_22], %34 {strides = array<i32>} : memref<1x1x128xf32, #tpu.memory_space<vmem>>, vector<1x1x128xf32>,
    return
  }
  func.func @transform_0(%arg0: i32) -> (i32, i32, i32) {
    %c0_i32 = arith.constant 0 : i32
    %c0_i32_0 = arith.constant 0 : i32
    %c0_i32_1 = arith.constant 0 : i32
    return %c0_i32, %arg0, %c0_i32_0 : i32, i32, i32
  }
  func.func @transform_1(%arg0: i32) -> (i32, i32) {
    %c0_i32 = arith.constant 0 : i32
    %c0_i32_0 = arith.constant 0 : i32
    %c0_i32_1 = arith.constant 0 : i32
    return %c0_i32, %c0_i32_0 : i32, i32
  }
  func.func @transform_2(%arg0: i32) -> (i32, i32) {
    %c0_i32 = arith.constant 0 : i32
    %c0_i32_0 = arith.constant 0 : i32
    %c0_i32_1 = arith.constant 0 : i32
    return %c0_i32, %c0_i32_0 : i32, i32
  }
  func.func @transform_3(%arg0: i32) -> (i32, i32, i32) {
    %c0_i32 = arith.constant 0 : i32
    %c0_i32_0 = arith.constant 0 : i32
    %c0_i32_1 = arith.constant 0 : i32
    %c0_i32_2 = arith.constant 0 : i32
    return %c0_i32, %c0_i32_0, %c0_i32_1 : i32, i32, i32
  }
  func.func @transform_4(%arg0: i32) -> (i32, i32, i32) {
    %c0_i32 = arith.constant 0 : i32
    %c0_i32_0 = arith.constant 0 : i32
    %c0_i32_1 = arith.constant 0 : i32
    %c0_i32_2 = arith.constant 0 : i32
    return %c0_i32, %c0_i32_0, %c0_i32_1 : i32, i32, i32
  }
  func.func @transform_5(%arg0: i32) -> (i32, i32) {
    %c0_i32 = arith.constant 0 : i32
    %c0_i32_0 = arith.constant 0 : i32
    %c0_i32_1 = arith.constant 0 : i32
    return %c0_i32, %c0_i32_0 : i32, i32
  }
  func.func @transform_6(%arg0: i32) -> (i32, i32) {
    %c0_i32 = arith.constant 0 : i32
    %c0_i32_0 = arith.constant 0 : i32
    %c0_i32_1 = arith.constant 0 : i32
    return %c0_i32, %c0_i32_0 : i32, i32
  }
  func.func @transform_7(%arg0: i32) -> (i32, i32, i32) {
    %c0_i32 = arith.constant 0 : i32
    %c0_i32_0 = arith.constant 0 : i32
    %c0_i32_1 = arith.constant 0 : i32
    return %arg0, %c0_i32, %c0_i32_0 : i32, i32, i32
  }
}

</mosaic_0001>

<bundles_post_ra>
// kernel: tpu_custom_call.1
= control target key start
LH: loop header
LB: loop body
LE: loop exit
PB: predicated region body
PF: predicated region fallthrough
CT: control target
= control target key end

     0   :  { %s2434_s0 = inlined_call_operand.hbm [shape: bf16[4,128,16], index: 0, kind: input, shape index: {}]   ;;  %s2435_s1 = inlined_call_operand.hbm [shape: bf16[16,128], index: 1, kind: input, shape index: {}]   ;;  %s2436_s2 = inlined_call_operand.hbm [shape: f32[1,128], index: 2, kind: input, shape index: {}]   ;;  %s2437_s3 = inlined_call_operand.hbm [shape: bf16[1,128,128], index: 3, kind: input, shape index: {}]   ;;  %s2438_s4 = inlined_call_operand.hbm [shape: f32[1,1,128], index: 4, kind: input, shape index: {}]   ;;  %s2439_s5 = inlined_call_operand.hbm [shape: f32[8,128], index: 5, kind: input, shape index: {}]   ;;  %s2440_s6 = inlined_call_operand.<no memory space> [shape: f32[1,1], index: 6, kind: input, shape index: {}]   ;;  %s2441_s7 = inlined_call_operand.hbm [shape: f32[1,1,128], index: 7, kind: output, shape index: {}]  }
   0x1   :  { %v12_v0 = vstv %s2440_s6 }
   0x2   :  { %13 = vst [vmem:[#allocation2] sm:$0x1] %v12_v0 }
   0x3   :  { %14 = vsyncpa [#allocation4], 0 }
   0x4   :  { %15 = vsyncpa [#allocation7], 0 }
   0x5   :  { %16 = vsyncpa [#allocation10], 0 }
   0x6   :  { %17 = vsyncpa [#allocation13], 0 }
   0x7   :  { %18 = vsyncpa [#allocation5], 0  ;;  %s1989_s26 = smov [#allocation6]   ;;  %s1990_s28 = smov [#allocation9]  }
   0x8   :  { %s36_s27 = sshll.u32 %s1989_s26, 4  ;;  %s58_s29 = sshll.u32 %s1990_s28, 4  ;;  %s37_s27 = int_to_ptr.vmem [resolvable:$true] %s36_s27  ;;  %s2045_s29 = int_to_ptr.vmem [resolvable:$true] %s58_s29 }
   0x9   :  { %s1825_s9 = scalar_lea.hbm %s2435_s1, 128 }
   0xa   :  { %p1826_p0 = scmp.ne.s32.totalorder %s2435_s1, %s1825_s9  ;;  %p1829_p1 = scmp.lt.u32.totalorder %s1825_s9, %s2435_s1 }
   0xc   :  { %p1831_p2 = pnand %p1829_p1, %p1826_p0 }
   0xe   :  { %1834 = shalt.err (!%p1831_p2)
}
   0xf   :  { %s1835_s13 = scalar_lea.vmem %s37_s27, 128  ;;  %p1840_p4 = scmp.lt.s32.totalorder %s37_s27, %s37_s27 }
  0x10   :  { %p1836_p3 = scmp.ne.s32.totalorder %s37_s27, %s1835_s13  ;;  %p1841_p5 = scmp.lt.s32.totalorder %s1835_s13, %s1835_s13 }
  0x12   :  { %p1842_p6 = por %p1841_p5, %p1840_p4 }
  0x14   :  { %p1843_p7 = pnand %p1842_p6, %p1836_p3 }
  0x16   :  { %1846 = shalt.err (!%p1843_p7)
}
  0x17   :  { %s1991_s14 = smov 64   ;;  %s1992_s15 = smov 4  }
  0x18   :  { %42 = dma.hbm_to_vmem [thread:$0]  %s2435_s1, 128, %s37_s27, [#allocation7], %s1991_s14, %s1991_s14, %s1992_s15  }
  0x19   :  { %s1847_s20 = scalar_lea.hbm %s2437_s3, 1024 }
  0x1a   :  { %p1848_p8 = scmp.ne.s32.totalorder %s2437_s3, %s1847_s20  ;;  %p1851_p9 = scmp.lt.u32.totalorder %s1847_s20, %s2437_s3 }
  0x1c   :  { %p1853_p10 = pnand %p1851_p9, %p1848_p8 }
  0x1e   :  { %1856 = shalt.err (!%p1853_p10)
}
  0x1f   :  { %s1857_s25 = scalar_lea.vmem %s2045_s29, 1024  ;;  %p1862_p12 = scmp.lt.s32.totalorder %s2045_s29, %s2045_s29 }
  0x20   :  { %p1858_p11 = scmp.ne.s32.totalorder %s2045_s29, %s1857_s25  ;;  %p1863_p13 = scmp.lt.s32.totalorder %s1857_s25, %s1857_s25 }
  0x22   :  { %p1864_p0 = por %p1863_p13, %p1862_p12 }
  0x24   :  { %p1865_p1 = pnand %p1864_p0, %p1858_p11 }
  0x26   :  { %1868 = shalt.err (!%p1865_p1)
}
  0x27   :  { %64 = dma.hbm_to_vmem [thread:$0]  %s2437_s3, 1024, %s2045_s29, [#allocation10], %s1991_s14, %s1991_s14, %s1992_s15  }
  0x28   :  { %s1993_s27 = smov [#allocation3]   ;;  %s1994_s30 = smov [#allocation8]  }
  0x29   :  { %s24_s28 = sshll.u32 %s1993_s27, 4  ;;  %s49_s8 = sshll.u32 %s1994_s30, 4  ;;  %s25_s28 = int_to_ptr.vmem [resolvable:$true] %s24_s28  ;;  %s50_s8 = int_to_ptr.vmem [resolvable:$true] %s49_s8 }
  0x2a   :  { %s1869_s11 = scalar_lea.hbm %s2434_s0, 4096 }
  0x2b   :  { %p1870_p2 = scmp.ne.s32.totalorder %s2434_s0, %s1869_s11  ;;  %p1873_p3 = scmp.lt.u32.totalorder %s1869_s11, %s2434_s0 }
  0x2d   :  { %p1875_p4 = pnand %p1873_p3, %p1870_p2 }
  0x2f   :  { %1878 = shalt.err (!%p1875_p4)
}
  0x30   :  { %s1879_s3 = scalar_lea.vmem %s25_s28, 4096  ;;  %p1884_p6 = scmp.lt.s32.totalorder %s25_s28, %s25_s28 }
  0x31   :  { %p1880_p5 = scmp.ne.s32.totalorder %s25_s28, %s1879_s3  ;;  %p1885_p7 = scmp.lt.s32.totalorder %s1879_s3, %s1879_s3 }
  0x33   :  { %p1886_p8 = por %p1885_p7, %p1884_p6 }
  0x35   :  { %p1887_p9 = pnand %p1886_p8, %p1880_p5 }
  0x37   :  { %1890 = shalt.err (!%p1887_p9)
}
  0x38   :  { %30 = dma.hbm_to_vmem [thread:$0]  %s2434_s0, 4096, %s25_s28, [#allocation4], %s1991_s14, %s1991_s14, %s1992_s15  }
  0x39   :  { %s1891_s20 = scalar_lea.hbm %s2436_s2, 16 }
  0x3a   :  { %p1892_p10 = scmp.ne.s32.totalorder %s2436_s2, %s1891_s20  ;;  %p1895_p11 = scmp.lt.u32.totalorder %s1891_s20, %s2436_s2 }
  0x3c   :  { %p1897_p12 = pnand %p1895_p11, %p1892_p10 }
  0x3e   :  { %1900 = shalt.err (!%p1897_p12)
}
  0x3f   :  { %s1901_s25 = scalar_lea.vmem %s50_s8, 16  ;;  %s1905_s1 = scalar_lea.vmem %s50_s8, 32 }
  0x40   :  { %p1902_p13 = scmp.ne.s32.totalorder %s50_s8, %s1901_s25  ;;  %p1906_p0 = scmp.lt.s32.totalorder %s50_s8, %s50_s8 }
  0x41   :  { %p1907_p1 = scmp.lt.s32.totalorder %s1905_s1, %s1901_s25 }
  0x43   :  { %p1908_p2 = por %p1907_p1, %p1906_p0 }
  0x45   :  { %p1909_p3 = pnand %p1908_p2, %p1902_p13 }
  0x47   :  { %1912 = shalt.err (!%p1909_p3)
}
  0x48   :  { %52 = dma.hbm_to_vmem [thread:$0]  %s2436_s2, 16, %s50_s8, [#allocation7]  }
  0x49   :  { %s1995_s15 = smov [#allocation11]   ;;  %s1996_s27 = smov [#allocation12]  }
  0x4a   :  { %s71_s26 = sshll.u32 %s1995_s15, 4  ;;  %s81_s28 = sshll.u32 %s1996_s27, 4  ;;  %s72_s26 = int_to_ptr.vmem [resolvable:$true] %s71_s26  ;;  %s82_s28 = int_to_ptr.vmem [resolvable:$true] %s81_s28 }
  0x4b   :  { %s1913_s10 = scalar_lea.hbm %s2438_s4, 16 }
  0x4c   :  { %p1914_p4 = scmp.ne.s32.totalorder %s2438_s4, %s1913_s10  ;;  %p1917_p5 = scmp.lt.u32.totalorder %s1913_s10, %s2438_s4 }
  0x4e   :  { %p1919_p6 = pnand %p1917_p5, %p1914_p4 }
  0x50   :  { %1922 = shalt.err (!%p1919_p6)
}
  0x51   :  { %s1923_s2 = scalar_lea.vmem %s72_s26, 16  ;;  %s1927_s8 = scalar_lea.vmem %s72_s26, 32 }
  0x52   :  { %p1924_p7 = scmp.ne.s32.totalorder %s72_s26, %s1923_s2  ;;  %p1928_p8 = scmp.lt.s32.totalorder %s72_s26, %s72_s26 }
  0x53   :  { %p1929_p9 = scmp.lt.s32.totalorder %s1927_s8, %s1923_s2 }
  0x55   :  { %p1930_p10 = por %p1929_p9, %p1928_p8 }
  0x57   :  { %p1931_p11 = pnand %p1930_p10, %p1924_p7 }
  0x59   :  { %1934 = shalt.err (!%p1931_p11)
}
  0x5a   :  { %74 = dma.hbm_to_vmem [thread:$0]  %s2438_s4, 16, %s72_s26, [#allocation10]  }
  0x5b   :  { %s1935_s18 = scalar_lea.hbm %s2439_s5, 128 }
  0x5c   :  { %p1936_p12 = scmp.ne.s32.totalorder %s2439_s5, %s1935_s18  ;;  %p1939_p13 = scmp.lt.u32.totalorder %s1935_s18, %s2439_s5 }
  0x5e   :  { %p1941_p0 = pnand %p1939_p13, %p1936_p12 }
  0x60   :  { %1944 = shalt.err (!%p1941_p0)
}
  0x61   :  { %s1945_s23 = scalar_lea.vmem %s82_s28, 128  ;;  %p1950_p2 = scmp.lt.s32.totalorder %s82_s28, %s82_s28 }
  0x62   :  { %p1946_p1 = scmp.ne.s32.totalorder %s82_s28, %s1945_s23  ;;  %p1951_p3 = scmp.lt.s32.totalorder %s1945_s23, %s1945_s23 }
  0x64   :  { %p1952_p4 = por %p1951_p3, %p1950_p2 }
  0x66   :  { %p1953_p5 = pnand %p1952_p4, %p1946_p1 }
  0x68   :  { %1956 = shalt.err (!%p1953_p5)
}
  0x69   :  { %84 = dma.hbm_to_vmem [thread:$0]  %s2439_s5, 128, %s82_s28, [#allocation13]  }
  0x6a   :  { %1979 = dma.done.wait [#allocation4], 4096  }
  0x6b   :  { %1980 = vsyncadd [#allocation4], 4294963200 }
  0x6c   :  { %1981 = dma.done.wait [#allocation7], 144  }
  0x6d   :  { %1982 = vsyncadd [#allocation7], 4294967152 }
  0x6e   :  { %1983 = dma.done.wait [#allocation10], 1040  }
  0x6f   :  { %1984 = vsyncadd [#allocation10], 4294966256 }
  0x70   :  { %1985 = dma.done.wait [#allocation13], 128  }
  0x71   :  { %1986 = vsyncadd [#allocation13], 4294967168  ;;  %v1784_v1 = vld [vmem:[#allocation6] sm:$0xff]   ;;  %vm345_vm0 = vcmask 130048   ;;  %v1786_v3 = vld [vmem:[#allocation3 + $0x8] sm:$0xff]   ;;  %vm1998_vm1 = vmmov 0  }
  0x72   :  { %v1785_v2 = vld [vmem:[#allocation3] sm:$0xff]   ;;  %1565 = vmatprep.subr.bf16.mxu0 %v1784_v1  ;;  %v1787_v4 = vld [vmem:[#allocation3 + $0x10] sm:$0xff]   ;;  %v1788_v5 = vld [vmem:[#allocation3 + $0x18] sm:$0xff]   ;;  %s2001_s5 = smov [#allocation14]  }
  0x73   :  { %1566 = vmatpush3.bf16.msra.mxu0 %v1784_v1  ;;  %1567 = vmatprep.mubr.msk.bf16.mxu0 %vm345_vm0, %v1785_v2  ;;  %v1789_v6 = vld [vmem:[#allocation3 + $0x20] sm:$0xff]   ;;  %v1790_v7 = vld [vmem:[#allocation3 + $0x28] sm:$0xff]   ;;  %v1791_v8 = vld [vmem:[#allocation3 + $0x30] sm:$0xff]   ;;  %s1388_s25 = sshll.u32 %s2001_s5, 4  ;;  %s1389_s25 = int_to_ptr.vmem [resolvable:$true] %s1388_s25 }
  0x74   :  { %v1792_v9 = vld [vmem:[#allocation3 + $0x38] sm:$0xff]   ;;  %v1793_v10 = vld [vmem:[#allocation3 + $0x40] sm:$0xff]   ;;  %v1794_v11 = vld [vmem:[#allocation3 + $0x48] sm:$0xff]   ;;  %s1957_s1 = scalar_lea.vmem %s1389_s25, 16  ;;  %s1961_s0 = scalar_lea.vmem %s1389_s25, 32 }
  0x75   :  { %v1817_v12 = vld [vmem:[#allocation9] sm:$0xff]   ;;  %v1818_v13 = vld [vmem:[#allocation9 + $0x8] sm:$0xff]   ;;  %v1819_v15 = vld [vmem:[#allocation9 + $0x10] sm:$0xff]   ;;  %p1958_p6 = scmp.ne.s32.totalorder %s1389_s25, %s1957_s1  ;;  %p1962_p7 = scmp.lt.s32.totalorder %s1389_s25, %s1389_s25 }
  0x76   :  { %1568 = vmatmul.mubr.msk.bf16.vlgmr.msra.gmra.mrb[0].mxu0 %vm345_vm0, %v1786_v3  ;;  %v1795_v14 = vld [vmem:[#allocation3 + $0x50] sm:$0xff]   ;;  %1631 = vmatprep.subr.bf16.mxu1 %v1817_v12  ;;  %v1820_v16 = vld [vmem:[#allocation9 + $0x18] sm:$0xff]   ;;  %v1796_v17 = vld [vmem:[#allocation3 + $0x58] sm:$0xff]   ;;  %p1963_p8 = scmp.lt.s32.totalorder %s1961_s0, %s1957_s1 }
  0x77   :  { %1571 = vmatprep.mubr.msk.bf16.mxu0 %vm345_vm0, %v1787_v4  ;;  %1632 = vmatpush3.bf16.msra.mxu1 %v1817_v12  ;;  %v1797_v18 = vld [vmem:[#allocation3 + $0x60] sm:$0xff]   ;;  %v1821_v19 = vld [vmem:[#allocation9 + $0x20] sm:$0xff]   ;;  %v1822_v20 = vld [vmem:[#allocation9 + $0x28] sm:$0xff]  }
  0x78   :  { %1633 = vmatprep.subr.bf16.mxu1 %v1818_v13  ;;  %v1798_v21 = vld [vmem:[#allocation3 + $0x68] sm:$0xff]   ;;  %v1799_v22 = vld [vmem:[#allocation3 + $0x70] sm:$0xff]   ;;  %v1800_v23 = vld [vmem:[#allocation3 + $0x78] sm:$0xff]   ;;  %p1964_p9 = por %p1963_p8, %p1962_p7 }
  0x79   :  { %v1801_v24 = vld [vmem:[#allocation3 + $0x80] sm:$0xff]   ;;  %v1802_v25 = vld [vmem:[#allocation3 + $0x88] sm:$0xff]   ;;  %v1803_v26 = vld [vmem:[#allocation3 + $0x90] sm:$0xff]  }
  0x7a   :  { %v1804_v27 = vld [vmem:[#allocation3 + $0x98] sm:$0xff]   ;;  %v1805_v28 = vld [vmem:[#allocation3 + $0xa0] sm:$0xff]   ;;  %v1806_v29 = vld [vmem:[#allocation3 + $0xa8] sm:$0xff]   ;;  %p1965_p10 = pnand %p1964_p9, %p1958_p6 }
  0x7b   :  { %1634 = vmatpush3.bf16.msra.mxu1 %v1818_v13  ;;  %v1807_v30 = vld [vmem:[#allocation3 + $0xb0] sm:$0xff]   ;;  %v1808_v31 = vld [vmem:[#allocation3 + $0xb8] sm:$0xff]   ;;  %v1809_v33 = vld [vmem:[#allocation3 + $0xc0] sm:$0xff]  }
  0x7c   :  { %1635 = vmatprep.subr.bf16.mxu1 %v1819_v15  ;;  %v1823_v32 = vld [vmem:[#allocation9 + $0x30] sm:$0xff]   ;;  %v1824_v34 = vld [vmem:[#allocation9 + $0x38] sm:$0xff]   ;;  %v1811_v36 = vld [vmem:[#allocation3 + $0xd0] sm:$0xff]  }
  0x7d   :  { %v1810_v35 = vld [vmem:[#allocation3 + $0xc8] sm:$0xff]   ;;  %v1812_v37 = vld [vmem:[#allocation3 + $0xd8] sm:$0xff]   ;;  %v1813_v38 = vld [vmem:[#allocation3 + $0xe0] sm:$0xff]  }
  0x7e   :  { %1572 = vmatmul.mubr.msk.bf16.gmra.mrb[4].mxu0 %vm345_vm0, %v1788_v5  ;;  %v1814_v39 = vld [vmem:[#allocation3 + $0xe8] sm:$0xff]   ;;  %v1815_v40 = vld [vmem:[#allocation3 + $0xf0] sm:$0xff]   ;;  %v1816_v41 = vld [vmem:[#allocation3 + $0xf8] sm:$0xff]  }
  0x7f   :  { %1575 = vmatprep.mubr.msk.bf16.mxu0 %vm345_vm0, %v1789_v6  ;;  %1636 = vmatpush3.bf16.msra.mxu1 %v1819_v15  ;;  %v2165_v42 = vld [vmem:[#allocation8] ss:$0 sm:$0xff] }
  0x80   :  { %1637 = vmatprep.subr.bf16.mxu1 %v1820_v16 }
  0x83   :  { %1638 = vmatpush3.bf16.msra.mxu1 %v1820_v16 }
  0x84   :  { %1639 = vmatprep.subr.bf16.mxu1 %v1821_v19 }
  0x86   :  { %1576 = vmatmul.mubr.msk.bf16.gmra.mrb[8].mxu0 %vm345_vm0, %v1790_v7 }
  0x87   :  { %1579 = vmatprep.mubr.msk.bf16.mxu0 %vm345_vm0, %v1791_v8  ;;  %1640 = vmatpush3.bf16.msra.mxu1 %v1821_v19 }
  0x88   :  { %1641 = vmatprep.subr.bf16.mxu1 %v1822_v20 }
  0x8b   :  { %1642 = vmatpush3.bf16.msra.mxu1 %v1822_v20 }
  0x8c   :  { %1643 = vmatprep.subr.bf16.mxu1 %v1823_v32 }
  0x8e   :  { %1580 = vmatmul.mubr.msk.bf16.gmra.mrb[12].mxu0 %vm345_vm0, %v1792_v9 }
  0x8f   :  { %1583 = vmatprep.mubr.msk.bf16.mxu0 %vm345_vm0, %v1793_v10  ;;  %1644 = vmatpush3.bf16.msra.mxu1 %v1823_v32 }
  0x90   :  { %1645 = vmatprep.subr.bf16.mxu1 %v1824_v34 }
  0x93   :  { %1646 = vmatpush3.bf16.msra.mxu1 %v1824_v34 }
  0x96   :  { %1584 = vmatmul.mubr.msk.bf16.gmra.mrb[16].mxu0 %vm345_vm0, %v1794_v11 }
  0x97   :  { %1587 = vmatprep.mubr.msk.bf16.mxu0 %vm345_vm0, %v1795_v14 }
  0x9e   :  { %1588 = vmatmul.mubr.msk.bf16.gmra.mrb[20].mxu0 %vm345_vm0, %v1796_v17 }
  0x9f   :  { %1591 = vmatprep.mubr.msk.bf16.mxu0 %vm345_vm0, %v1797_v18 }
  0xa6   :  { %1592 = vmatmul.mubr.msk.bf16.gmra.mrb[24].mxu0 %vm345_vm0, %v1798_v21 }
  0xa7   :  { %1595 = vmatprep.mubr.msk.bf16.mxu0 %vm345_vm0, %v1799_v22 }
  0xae   :  { %1596 = vmatmul.mubr.msk.bf16.gmra.mrb[28].mxu0 %vm345_vm0, %v1800_v23 }
  0xaf   :  { %1599 = vmatprep.mubr.msk.bf16.mxu0 %vm345_vm0, %v1801_v24 }
  0xb6   :  { %1600 = vmatmul.mubr.msk.bf16.gmra.mrb[32].mxu0 %vm345_vm0, %v1802_v25 }
  0xb7   :  { %1603 = vmatprep.mubr.msk.bf16.mxu0 %vm345_vm0, %v1803_v26 }
  0xbe   :  { %1604 = vmatmul.mubr.msk.bf16.gmra.mrb[36].mxu0 %vm345_vm0, %v1804_v27 }
  0xbf   :  { %1607 = vmatprep.mubr.msk.bf16.mxu0 %vm345_vm0, %v1805_v28 }
  0xc6   :  { %1608 = vmatmul.mubr.msk.bf16.gmra.mrb[40].mxu0 %vm345_vm0, %v1806_v29 }
  0xc7   :  { %1611 = vmatprep.mubr.msk.bf16.mxu0 %vm345_vm0, %v1807_v30 }
  0xce   :  { %1612 = vmatmul.mubr.msk.bf16.gmra.mrb[44].mxu0 %vm345_vm0, %v1808_v31 }
  0xcf   :  { %1615 = vmatprep.mubr.msk.bf16.mxu0 %vm345_vm0, %v1809_v33 }
  0xd6   :  { %1616 = vmatmul.mubr.msk.bf16.gmra.mrb[48].mxu0 %vm345_vm0, %v1810_v35 }
  0xd7   :  { %1619 = vmatprep.mubr.msk.bf16.mxu0 %vm345_vm0, %v1811_v36 }
  0xde   :  { %1620 = vmatmul.mubr.msk.bf16.gmra.mrb[52].mxu0 %vm345_vm0, %v1812_v37 }
  0xdf   :  { %1623 = vmatprep.mubr.msk.bf16.mxu0 %vm345_vm0, %v1813_v38 }
  0xe6   :  { %1624 = vmatmul.mubr.msk.bf16.gmra.mrb[56].mxu0 %vm345_vm0, %v1814_v39 }
  0xe7   :  { %1627 = vmatprep.mubr.msk.bf16.mxu0 %vm345_vm0, %v1815_v40 }
  0xee   :  { %1628 = vmatmul.mubr.msk.bf16.gmra.mrb[60].mxu0 %vm345_vm0, %v1816_v41 }
 0x149   :  { %v1569_v43 = vpop.f32.mrb[0].mxu0 }
 0x14a   :  { %v485_v44 = vadd.f32 %v1569_v43, %v2165_v42  ;;  %v476_v45 = vpop.f32.mrb[1].mxu0 }
 0x14b   :  { %v477_v46 = vadd.f32 %v2165_v42, %v476_v45  ;;  %v1570_v47 = vpop.f32.mrb[2].mxu0 }
 0x14c   :  { %v488_v48 = vadd.f32 %v1570_v47, %v2165_v42  ;;  %v479_v49 = vpop.f32.mrb[3].mxu0  ;;  %v733_v51 = vmax.f32 %v485_v44, 0.0 }
 0x14d   :  { %v480_v50 = vadd.f32 %v2165_v42, %v479_v49  ;;  %v731_v53 = vmax.f32 %v477_v46, 0.0 }
 0x14e   :  { %v734_v52 = vmax.f32 %v488_v48, 0.0 }
 0x14f   :  { %v732_v54 = vmax.f32 %v480_v50, 0.0 }
 0x150   :  { %v796_v55 = vpack.c.bf16 %v734_v52, %v733_v51 }
 0x151   :  { %v1573_v56 = vpop.f32.mrb[4].mxu0  ;;  %v795_v57 = vpack.c.bf16 %v732_v54, %v731_v53 }
 0x152   :  { %v501_v58 = vadd.f32 %v1573_v56, %v2165_v42  ;;  %v492_v59 = vpop.f32.mrb[5].mxu0 }
 0x153   :  { %v493_v60 = vadd.f32 %v2165_v42, %v492_v59  ;;  %v1574_v61 = vpop.f32.mrb[6].mxu0  ;;  %1647 = vmatprep.mubr.bf16.mxu1 %v795_v57 }
 0x154   :  { %v504_v62 = vadd.f32 %v1574_v61, %v2165_v42  ;;  %v495_v63 = vpop.f32.mrb[7].mxu0  ;;  %1648 = vmatmul.mubr.bf16.vlgmr.msra.gmra.mrb[0].mxu1 %v796_v55  ;;  %v737_v1 = vmax.f32 %v501_v58, 0.0 }
 0x155   :  { %v496_v0 = vadd.f32 %v2165_v42, %v495_v63  ;;  %v735_v3 = vmax.f32 %v493_v60, 0.0 }
 0x156   :  { %v738_v2 = vmax.f32 %v504_v62, 0.0 }
 0x157   :  { %v736_v4 = vmax.f32 %v496_v0, 0.0 }
 0x158   :  { %v798_v5 = vpack.c.bf16 %v738_v2, %v737_v1 }
 0x159   :  { %v797_v6 = vpack.c.bf16 %v736_v4, %v735_v3  ;;  %v1577_v7 = vpop.f32.mrb[8].mxu0 }
 0x15a   :  { %v517_v8 = vadd.f32 %v1577_v7, %v2165_v42  ;;  %v508_v9 = vpop.f32.mrb[9].mxu0 }
 0x15b   :  { %v509_v10 = vadd.f32 %v2165_v42, %v508_v9  ;;  %v1578_v11 = vpop.f32.mrb[10].mxu0  ;;  %1651 = vmatprep.mubr.bf16.mxu1 %v797_v6 }
 0x15c   :  { %v520_v12 = vadd.f32 %v1578_v11, %v2165_v42  ;;  %v511_v13 = vpop.f32.mrb[11].mxu0  ;;  %1652 = vmatmul.mubr.bf16.gmra.mrb[4].mxu1 %v798_v5  ;;  %v741_v15 = vmax.f32 %v517_v8, 0.0 }
 0x15d   :  { %v512_v14 = vadd.f32 %v2165_v42, %v511_v13  ;;  %v739_v17 = vmax.f32 %v509_v10, 0.0 }
 0x15e   :  { %v742_v16 = vmax.f32 %v520_v12, 0.0 }
 0x15f   :  { %v740_v18 = vmax.f32 %v512_v14, 0.0 }
 0x160   :  { %v800_v19 = vpack.c.bf16 %v742_v16, %v741_v15 }
 0x161   :  { %v799_v20 = vpack.c.bf16 %v740_v18, %v739_v17  ;;  %v1581_v21 = vpop.f32.mrb[12].mxu0 }
 0x162   :  { %v533_v22 = vadd.f32 %v1581_v21, %v2165_v42  ;;  %v524_v23 = vpop.f32.mrb[13].mxu0 }
 0x163   :  { %v525_v24 = vadd.f32 %v2165_v42, %v524_v23  ;;  %v1582_v25 = vpop.f32.mrb[14].mxu0  ;;  %1655 = vmatprep.mubr.bf16.mxu1 %v799_v20 }
 0x164   :  { %v536_v26 = vadd.f32 %v1582_v25, %v2165_v42  ;;  %v527_v27 = vpop.f32.mrb[15].mxu0  ;;  %1656 = vmatmul.mubr.bf16.gmra.mrb[8].mxu1 %v800_v19  ;;  %v745_v29 = vmax.f32 %v533_v22, 0.0 }
 0x165   :  { %v528_v28 = vadd.f32 %v2165_v42, %v527_v27  ;;  %v743_v31 = vmax.f32 %v525_v24, 0.0 }
 0x166   :  { %v746_v30 = vmax.f32 %v536_v26, 0.0 }
 0x167   :  { %v744_v32 = vmax.f32 %v528_v28, 0.0 }
 0x168   :  { %v802_v33 = vpack.c.bf16 %v746_v30, %v745_v29 }
 0x169   :  { %v801_v34 = vpack.c.bf16 %v744_v32, %v743_v31  ;;  %v1585_v35 = vpop.f32.mrb[16].mxu0 }
 0x16a   :  { %v549_v36 = vadd.f32 %v1585_v35, %v2165_v42  ;;  %v540_v37 = vpop.f32.mrb[17].mxu0 }
 0x16b   :  { %v541_v38 = vadd.f32 %v2165_v42, %v540_v37  ;;  %v1586_v39 = vpop.f32.mrb[18].mxu0  ;;  %1659 = vmatprep.mubr.bf16.mxu1 %v801_v34 }
 0x16c   :  { %v552_v40 = vadd.f32 %v1586_v39, %v2165_v42  ;;  %v543_v41 = vpop.f32.mrb[19].mxu0  ;;  %1660 = vmatmul.mubr.bf16.gmra.mrb[12].mxu1 %v802_v33  ;;  %v749_v44 = vmax.f32 %v549_v36, 0.0 }
 0x16d   :  { %v544_v43 = vadd.f32 %v2165_v42, %v543_v41  ;;  %v747_v46 = vmax.f32 %v541_v38, 0.0 }
 0x16e   :  { %v750_v45 = vmax.f32 %v552_v40, 0.0 }
 0x16f   :  { %v748_v47 = vmax.f32 %v544_v43, 0.0 }
 0x170   :  { %v804_v48 = vpack.c.bf16 %v750_v45, %v749_v44 }
 0x171   :  { %v803_v49 = vpack.c.bf16 %v748_v47, %v747_v46  ;;  %v1589_v50 = vpop.f32.mrb[20].mxu0 }
 0x172   :  { %v565_v51 = vadd.f32 %v1589_v50, %v2165_v42  ;;  %v556_v52 = vpop.f32.mrb[21].mxu0 }
 0x173   :  { %v557_v53 = vadd.f32 %v2165_v42, %v556_v52  ;;  %v1590_v54 = vpop.f32.mrb[22].mxu0  ;;  %1663 = vmatprep.mubr.bf16.mxu1 %v803_v49 }
 0x174   :  { %v568_v55 = vadd.f32 %v1590_v54, %v2165_v42  ;;  %v559_v56 = vpop.f32.mrb[23].mxu0  ;;  %1664 = vmatmul.mubr.bf16.gmra.mrb[16].mxu1 %v804_v48  ;;  %v753_v58 = vmax.f32 %v565_v51, 0.0 }
 0x175   :  { %v560_v57 = vadd.f32 %v2165_v42, %v559_v56  ;;  %v751_v60 = vmax.f32 %v557_v53, 0.0 }
 0x176   :  { %v754_v59 = vmax.f32 %v568_v55, 0.0 }
 0x177   :  { %v752_v61 = vmax.f32 %v560_v57, 0.0 }
 0x178   :  { %v806_v62 = vpack.c.bf16 %v754_v59, %v753_v58 }
 0x179   :  { %v805_v63 = vpack.c.bf16 %v752_v61, %v751_v60  ;;  %v1593_v0 = vpop.f32.mrb[24].mxu0 }
 0x17a   :  { %v581_v1 = vadd.f32 %v1593_v0, %v2165_v42  ;;  %v572_v2 = vpop.f32.mrb[25].mxu0 }
 0x17b   :  { %v573_v3 = vadd.f32 %v2165_v42, %v572_v2  ;;  %v1594_v4 = vpop.f32.mrb[26].mxu0  ;;  %1667 = vmatprep.mubr.bf16.mxu1 %v805_v63 }
 0x17c   :  { %v584_v5 = vadd.f32 %v1594_v4, %v2165_v42  ;;  %v575_v6 = vpop.f32.mrb[27].mxu0  ;;  %1668 = vmatmul.mubr.bf16.gmra.mrb[20].mxu1 %v806_v62  ;;  %v757_v8 = vmax.f32 %v581_v1, 0.0 }
 0x17d   :  { %v576_v7 = vadd.f32 %v2165_v42, %v575_v6  ;;  %v755_v10 = vmax.f32 %v573_v3, 0.0 }
 0x17e   :  { %v758_v9 = vmax.f32 %v584_v5, 0.0 }
 0x17f   :  { %v756_v11 = vmax.f32 %v576_v7, 0.0 }
 0x180   :  { %v808_v12 = vpack.c.bf16 %v758_v9, %v757_v8 }
 0x181   :  { %v807_v13 = vpack.c.bf16 %v756_v11, %v755_v10  ;;  %v1597_v14 = vpop.f32.mrb[28].mxu0 }
 0x182   :  { %v597_v15 = vadd.f32 %v1597_v14, %v2165_v42  ;;  %v588_v16 = vpop.f32.mrb[29].mxu0 }
 0x183   :  { %v589_v17 = vadd.f32 %v2165_v42, %v588_v16  ;;  %v1598_v18 = vpop.f32.mrb[30].mxu0  ;;  %1671 = vmatprep.mubr.bf16.mxu1 %v807_v13 }
 0x184   :  { %v600_v19 = vadd.f32 %v1598_v18, %v2165_v42  ;;  %v591_v20 = vpop.f32.mrb[31].mxu0  ;;  %1672 = vmatmul.mubr.bf16.gmra.mrb[24].mxu1 %v808_v12  ;;  %v761_v22 = vmax.f32 %v597_v15, 0.0 }
 0x185   :  { %v592_v21 = vadd.f32 %v2165_v42, %v591_v20  ;;  %v759_v24 = vmax.f32 %v589_v17, 0.0 }
 0x186   :  { %v762_v23 = vmax.f32 %v600_v19, 0.0 }
 0x187   :  { %v760_v25 = vmax.f32 %v592_v21, 0.0 }
 0x188   :  { %v810_v26 = vpack.c.bf16 %v762_v23, %v761_v22 }
 0x189   :  { %v809_v27 = vpack.c.bf16 %v760_v25, %v759_v24  ;;  %v1601_v28 = vpop.f32.mrb[32].mxu0 }
 0x18a   :  { %v613_v29 = vadd.f32 %v1601_v28, %v2165_v42  ;;  %v604_v30 = vpop.f32.mrb[33].mxu0 }
 0x18b   :  { %v605_v31 = vadd.f32 %v2165_v42, %v604_v30  ;;  %v1602_v32 = vpop.f32.mrb[34].mxu0  ;;  %1675 = vmatprep.mubr.bf16.mxu1 %v809_v27 }
 0x18c   :  { %v616_v33 = vadd.f32 %v1602_v32, %v2165_v42  ;;  %v607_v34 = vpop.f32.mrb[35].mxu0  ;;  %1676 = vmatmul.mubr.bf16.gmra.mrb[28].mxu1 %v810_v26  ;;  %v765_v36 = vmax.f32 %v613_v29, 0.0 }
 0x18d   :  { %v608_v35 = vadd.f32 %v2165_v42, %v607_v34  ;;  %v763_v38 = vmax.f32 %v605_v31, 0.0 }
 0x18e   :  { %v766_v37 = vmax.f32 %v616_v33, 0.0 }
 0x18f   :  { %v764_v39 = vmax.f32 %v608_v35, 0.0 }
 0x190   :  { %v812_v40 = vpack.c.bf16 %v766_v37, %v765_v36 }
 0x191   :  { %v811_v41 = vpack.c.bf16 %v764_v39, %v763_v38  ;;  %v1605_v43 = vpop.f32.mrb[36].mxu0 }
 0x192   :  { %v629_v44 = vadd.f32 %v1605_v43, %v2165_v42  ;;  %v620_v45 = vpop.f32.mrb[37].mxu0 }
 0x193   :  { %v621_v46 = vadd.f32 %v2165_v42, %v620_v45  ;;  %v1606_v47 = vpop.f32.mrb[38].mxu0  ;;  %1679 = vmatprep.mubr.bf16.mxu1 %v811_v41 }
 0x194   :  { %v632_v48 = vadd.f32 %v1606_v47, %v2165_v42  ;;  %v623_v49 = vpop.f32.mrb[39].mxu0  ;;  %1680 = vmatmul.mubr.bf16.gmra.mrb[32].mxu1 %v812_v40  ;;  %v769_v51 = vmax.f32 %v629_v44, 0.0 }
 0x195   :  { %v624_v50 = vadd.f32 %v2165_v42, %v623_v49  ;;  %v767_v53 = vmax.f32 %v621_v46, 0.0 }
 0x196   :  { %v770_v52 = vmax.f32 %v632_v48, 0.0 }
 0x197   :  { %v768_v54 = vmax.f32 %v624_v50, 0.0 }
 0x198   :  { %v814_v55 = vpack.c.bf16 %v770_v52, %v769_v51 }
 0x199   :  { %v813_v56 = vpack.c.bf16 %v768_v54, %v767_v53  ;;  %v1609_v57 = vpop.f32.mrb[40].mxu0 }
 0x19a   :  { %v645_v58 = vadd.f32 %v1609_v57, %v2165_v42  ;;  %v636_v59 = vpop.f32.mrb[41].mxu0 }
 0x19b   :  { %v637_v60 = vadd.f32 %v2165_v42, %v636_v59  ;;  %v1610_v61 = vpop.f32.mrb[42].mxu0  ;;  %1683 = vmatprep.mubr.bf16.mxu1 %v813_v56 }
 0x19c   :  { %v648_v62 = vadd.f32 %v1610_v61, %v2165_v42  ;;  %v639_v63 = vpop.f32.mrb[43].mxu0  ;;  %1684 = vmatmul.mubr.bf16.gmra.mrb[36].mxu1 %v814_v55  ;;  %v773_v1 = vmax.f32 %v645_v58, 0.0 }
 0x19d   :  { %v640_v0 = vadd.f32 %v2165_v42, %v639_v63  ;;  %v771_v3 = vmax.f32 %v637_v60, 0.0 }
 0x19e   :  { %v774_v2 = vmax.f32 %v648_v62, 0.0 }
 0x19f   :  { %v772_v4 = vmax.f32 %v640_v0, 0.0 }
 0x1a0   :  { %v816_v5 = vpack.c.bf16 %v774_v2, %v773_v1 }
 0x1a1   :  { %v815_v6 = vpack.c.bf16 %v772_v4, %v771_v3  ;;  %v1613_v7 = vpop.f32.mrb[44].mxu0 }
 0x1a2   :  { %v661_v8 = vadd.f32 %v1613_v7, %v2165_v42  ;;  %v652_v9 = vpop.f32.mrb[45].mxu0 }
 0x1a3   :  { %v653_v10 = vadd.f32 %v2165_v42, %v652_v9  ;;  %v1614_v11 = vpop.f32.mrb[46].mxu0  ;;  %1687 = vmatprep.mubr.bf16.mxu1 %v815_v6 }
 0x1a4   :  { %v664_v12 = vadd.f32 %v1614_v11, %v2165_v42  ;;  %v655_v13 = vpop.f32.mrb[47].mxu0  ;;  %1688 = vmatmul.mubr.bf16.gmra.mrb[40].mxu1 %v816_v5  ;;  %v777_v15 = vmax.f32 %v661_v8, 0.0 }
 0x1a5   :  { %v656_v14 = vadd.f32 %v2165_v42, %v655_v13  ;;  %v775_v17 = vmax.f32 %v653_v10, 0.0 }
 0x1a6   :  { %v778_v16 = vmax.f32 %v664_v12, 0.0 }
 0x1a7   :  { %v776_v18 = vmax.f32 %v656_v14, 0.0  ;;  %v1997_v14 = vmov 0.0|0.0  }
 0x1a8   :  { %v818_v19 = vpack.c.bf16 %v778_v16, %v777_v15  ;;  %1746 = vmatprep.subr.bf16.mxu0 %v1997_v14 }
 0x1a9   :  { %v817_v20 = vpack.c.bf16 %v776_v18, %v775_v17  ;;  %v1617_v21 = vpop.f32.mrb[48].mxu0 }
 0x1aa   :  { %v677_v22 = vadd.f32 %v1617_v21, %v2165_v42  ;;  %v668_v23 = vpop.f32.mrb[49].mxu0 }
 0x1ab   :  { %v669_v24 = vadd.f32 %v2165_v42, %v668_v23  ;;  %v1618_v25 = vpop.f32.mrb[50].mxu0  ;;  %1691 = vmatprep.mubr.bf16.mxu1 %v817_v20 }
 0x1ac   :  { %v680_v26 = vadd.f32 %v1618_v25, %v2165_v42  ;;  %v671_v27 = vpop.f32.mrb[51].mxu0  ;;  %1692 = vmatmul.mubr.bf16.gmra.mrb[44].mxu1 %v818_v19  ;;  %v781_v29 = vmax.f32 %v677_v22, 0.0 }
 0x1ad   :  { %v672_v28 = vadd.f32 %v2165_v42, %v671_v27  ;;  %v779_v31 = vmax.f32 %v669_v24, 0.0 }
 0x1ae   :  { %v782_v30 = vmax.f32 %v680_v26, 0.0 }
 0x1af   :  { %v780_v32 = vmax.f32 %v672_v28, 0.0 }
 0x1b0   :  { %v820_v33 = vpack.c.bf16 %v782_v30, %v781_v29  ;;  %v2246_v30 = vld [vmem:[#allocation11] ss:$0 sm:$0xff] }
 0x1b1   :  { %v819_v34 = vpack.c.bf16 %v780_v32, %v779_v31  ;;  %v1621_v35 = vpop.f32.mrb[52].mxu0 }
 0x1b2   :  { %v693_v36 = vadd.f32 %v1621_v35, %v2165_v42  ;;  %v684_v37 = vpop.f32.mrb[53].mxu0 }
 0x1b3   :  { %v685_v38 = vadd.f32 %v2165_v42, %v684_v37  ;;  %v1622_v39 = vpop.f32.mrb[54].mxu0  ;;  %1695 = vmatprep.mubr.bf16.mxu1 %v819_v34 }
 0x1b4   :  { %v785_v40 = vmax.f32 %v693_v36, 0.0  ;;  %v696_v41 = vadd.f32 %v1622_v39, %v2165_v42  ;;  %v687_v43 = vpop.f32.mrb[55].mxu0  ;;  %1696 = vmatmul.mubr.bf16.gmra.mrb[48].mxu1 %v820_v33 }
 0x1b5   :  { %v783_v44 = vmax.f32 %v685_v38, 0.0  ;;  %v688_v45 = vadd.f32 %v2165_v42, %v687_v43 }
 0x1b6   :  { %v786_v46 = vmax.f32 %v696_v41, 0.0 }
 0x1b7   :  { %v784_v47 = vmax.f32 %v688_v45, 0.0 }
 0x1b8   :  { %v822_v48 = vpack.c.bf16 %v786_v46, %v785_v40 }
 0x1b9   :  { %v821_v49 = vpack.c.bf16 %v784_v47, %v783_v44  ;;  %v1625_v50 = vpop.f32.mrb[56].mxu0 }
 0x1ba   :  { %v709_v51 = vadd.f32 %v1625_v50, %v2165_v42  ;;  %v700_v52 = vpop.f32.mrb[57].mxu0 }
 0x1bb   :  { %v701_v53 = vadd.f32 %v2165_v42, %v700_v52  ;;  %v1626_v54 = vpop.f32.mrb[58].mxu0  ;;  %1699 = vmatprep.mubr.bf16.mxu1 %v821_v49 }
 0x1bc   :  { %v789_v55 = vmax.f32 %v709_v51, 0.0  ;;  %v712_v56 = vadd.f32 %v1626_v54, %v2165_v42  ;;  %v703_v57 = vpop.f32.mrb[59].mxu0  ;;  %1700 = vmatmul.mubr.bf16.gmra.mrb[52].mxu1 %v822_v48  ;;  %v1999_v51 = vmov 0.0  }
 0x1bd   :  { %v787_v58 = vmax.f32 %v701_v53, 0.0  ;;  %v704_v59 = vadd.f32 %v2165_v42, %v703_v57  ;;  %1743 = vmatprep.mubr.msk.f32.mxu0 %vm1998_vm1, %v1999_v51 }
 0x1be   :  { %v790_v60 = vmax.f32 %v712_v56, 0.0 }
 0x1bf   :  { %v788_v61 = vmax.f32 %v704_v59, 0.0 }
 0x1c0   :  { %v824_v62 = vpack.c.bf16 %v790_v60, %v789_v55 }
 0x1c1   :  { %v823_v63 = vpack.c.bf16 %v788_v61, %v787_v58  ;;  %v1629_v0 = vpop.f32.mrb[60].mxu0 }
 0x1c2   :  { %v725_v1 = vadd.f32 %v1629_v0, %v2165_v42  ;;  %v716_v2 = vpop.f32.mrb[61].mxu0 }
 0x1c3   :  { %v717_v3 = vadd.f32 %v2165_v42, %v716_v2  ;;  %v1630_v4 = vpop.f32.mrb[62].mxu0  ;;  %1703 = vmatprep.mubr.bf16.mxu1 %v823_v63 }
 0x1c4   :  { %v793_v5 = vmax.f32 %v725_v1, 0.0  ;;  %v728_v6 = vadd.f32 %v1630_v4, %v2165_v42  ;;  %v719_v7 = vpop.f32.mrb[63].mxu0  ;;  %1704 = vmatmul.mubr.bf16.gmra.mrb[56].mxu1 %v824_v62 }
 0x1c5   :  { %v791_v8 = vmax.f32 %v717_v3, 0.0  ;;  %v720_v9 = vadd.f32 %v2165_v42, %v719_v7 }
 0x1c6   :  { %v794_v10 = vmax.f32 %v728_v6, 0.0  ;;  %v1370_v6 = vld [vmem:[#allocation2] sm:$0x1] }
 0x1c7   :  { %v792_v11 = vmax.f32 %v720_v9, 0.0 }
 0x1c8   :  { %v826_v12 = vpack.c.bf16 %v794_v10, %v793_v5  ;;  %v2000_v10 = vmov 0  }
 0x1c9   :  { %v825_v13 = vpack.c.bf16 %v792_v11, %v791_v8  ;;  %1783 = vset.pattern.permute.xlu0 %v2000_v10 }
 0x1ca   :  { %1373 = vperm.xlu0 %1783, %v1370_v6  }
 0x1cb   :  { %1707 = vmatprep.mubr.bf16.mxu1 %v825_v13 }
 0x1cc   :  { %1708 = vmatmul.mubr.bf16.gmra.mrb[60].mxu1 %v826_v12 }
 0x227   :  { %v1649_v15 = vpop.f32.mrb[0].mxu1 }
 0x228   :  { %v932_v16 = vpop.f32.mrb[1].mxu1  ;;  %v941_v31 = vadd.f32 %v1649_v15, %v2246_v30 }
 0x229   :  { %v1650_v17 = vpop.f32.mrb[2].mxu1  ;;  %v933_v32 = vadd.f32 %v2246_v30, %v932_v16 }
 0x22a   :  { %v935_v18 = vpop.f32.mrb[3].mxu1  ;;  %v944_v34 = vadd.f32 %v1650_v17, %v2246_v30  ;;  %v1189_v40 = vmax.f32 %v941_v31, 0.0 }
 0x22b   :  { %v936_v37 = vadd.f32 %v2246_v30, %v935_v18  ;;  %v1187_v41 = vmax.f32 %v933_v32, 0.0 }
 0x22c   :  { %v1190_v48 = vmax.f32 %v944_v34, 0.0 }
 0x22d   :  { %v1188_v52 = vmax.f32 %v936_v37, 0.0 }
 0x22f   :  { %v1653_v19 = vpop.f32.mrb[4].mxu1 }
 0x230   :  { %v948_v20 = vpop.f32.mrb[5].mxu1  ;;  %v957_v55 = vadd.f32 %v1653_v19, %v2246_v30 }
 0x231   :  { %v1654_v21 = vpop.f32.mrb[6].mxu1  ;;  %v949_v57 = vadd.f32 %v2246_v30, %v948_v20 }
 0x232   :  { %v951_v22 = vpop.f32.mrb[7].mxu1  ;;  %v960_v60 = vadd.f32 %v1654_v21, %v2246_v30  ;;  %v1193_v2 = vmax.f32 %v957_v55, 0.0 }
 0x233   :  { %v952_v63 = vadd.f32 %v2246_v30, %v951_v22  ;;  %v1191_v7 = vmax.f32 %v949_v57, 0.0 }
 0x234   :  { %v1194_v11 = vmax.f32 %v960_v60, 0.0 }
 0x235   :  { %v1192_v15 = vmax.f32 %v952_v63, 0.0 }
 0x237   :  { %v1657_v23 = vpop.f32.mrb[8].mxu1 }
 0x238   :  { %v2232_v24 = vpop.f32.mrb[9].mxu1  ;;  %v973_v18 = vadd.f32 %v1657_v23, %v2246_v30 }
 0x239   :  { %v2234_v42 = vpop.f32.mrb[10].mxu1  ;;  %v965_v20 = vadd.f32 %v2246_v30, %v2232_v24 }
 0x23a   :  { %v2236_v25 = vpop.f32.mrb[11].mxu1  ;;  %v976_v31 = vadd.f32 %v2234_v42, %v2246_v30 }
 0x23b   :  { %v968_v34 = vadd.f32 %v2246_v30, %v2236_v25 }
 0x23f   :  { %v2238_v26 = vpop.f32.mrb[12].mxu1 }
 0x240   :  { %v2240_v27 = vpop.f32.mrb[13].mxu1 }
 0x241   :  { %v2242_v28 = vpop.f32.mrb[14].mxu1 }
 0x242   :  { %v2244_v29 = vpop.f32.mrb[15].mxu1 }
 0x247   :  { %v1665_v33 = vpop.f32.mrb[16].mxu1 }
 0x248   :  { %v1005_v35 = vadd.f32 %v1665_v33, %v2246_v30  ;;  %v996_v36 = vpop.f32.mrb[17].mxu1 }
 0x249   :  { %v997_v38 = vadd.f32 %v2246_v30, %v996_v36  ;;  %v1666_v39 = vpop.f32.mrb[18].mxu1  ;;  %v1197_v36 = vmax.f32 %v973_v18, 0.0 }
 0x24a   :  { %v1205_v43 = vmax.f32 %v1005_v35, 0.0  ;;  %v1008_v44 = vadd.f32 %v1666_v39, %v2246_v30  ;;  %v999_v45 = vpop.f32.mrb[19].mxu1  ;;  %v1195_v39 = vmax.f32 %v965_v20, 0.0 }
 0x24b   :  { %v1203_v46 = vmax.f32 %v997_v38, 0.0  ;;  %v1000_v47 = vadd.f32 %v2246_v30, %v999_v45  ;;  %v1196_v45 = vmax.f32 %v968_v34, 0.0 }
 0x24c   :  { %v2256_v49 = vadd.f32 %v1205_v43, %v1189_v40  ;;  %v1206_v50 = vmax.f32 %v1008_v44, 0.0  ;;  %v1198_v43 = vmax.f32 %v976_v31, 0.0 }
 0x24d   :  { %v2258_v53 = vadd.f32 %v1203_v46, %v1187_v41  ;;  %v1204_v54 = vmax.f32 %v1000_v47, 0.0  ;;  %v989_v47 = vadd.f32 %v2238_v26, %v2246_v30 }
 0x24e   :  { %v2261_v56 = vadd.f32 %v1206_v50, %v1190_v48  ;;  %v981_v50 = vadd.f32 %v2246_v30, %v2240_v27 }
 0x24f   :  { %v2264_v58 = vadd.f32 %v1204_v54, %v1188_v52  ;;  %v1669_v59 = vpop.f32.mrb[20].mxu1  ;;  %v992_v54 = vadd.f32 %v2242_v28, %v2246_v30 }
 0x250   :  { %v1021_v61 = vadd.f32 %v1669_v59, %v2246_v30  ;;  %v1012_v62 = vpop.f32.mrb[21].mxu1  ;;  %v984_v59 = vadd.f32 %v2246_v30, %v2244_v29 }
 0x251   :  { %v1013_v0 = vadd.f32 %v2246_v30, %v1012_v62  ;;  %v1670_v1 = vpop.f32.mrb[22].mxu1 }
 0x252   :  { %v1209_v3 = vmax.f32 %v1021_v61, 0.0  ;;  %v1024_v4 = vadd.f32 %v1670_v1, %v2246_v30  ;;  %v1015_v5 = vpop.f32.mrb[23].mxu1  ;;  %v1201_v61 = vmax.f32 %v989_v47, 0.0 }
 0x253   :  { %v1207_v8 = vmax.f32 %v1013_v0, 0.0  ;;  %v1016_v9 = vadd.f32 %v2246_v30, %v1015_v5  ;;  %v1199_v0 = vmax.f32 %v981_v50, 0.0  ;;  %v1200_v5 = vmax.f32 %v984_v59, 0.0 }
 0x254   :  { %v2272_v12 = vadd.f32 %v1209_v3, %v1193_v2  ;;  %v1210_v13 = vmax.f32 %v1024_v4, 0.0  ;;  %v1202_v3 = vmax.f32 %v992_v54, 0.0 }
 0x255   :  { %v2274_v16 = vadd.f32 %v1207_v8, %v1191_v7  ;;  %v1208_v17 = vmax.f32 %v1016_v9, 0.0 }
 0x256   :  { %v2277_v19 = vadd.f32 %v1210_v13, %v1194_v11 }
 0x257   :  { %v2281_v21 = vadd.f32 %v1208_v17, %v1192_v15  ;;  %v1673_v22 = vpop.f32.mrb[24].mxu1 }
 0x258   :  { %v1037_v32 = vadd.f32 %v1673_v22, %v2246_v30  ;;  %v1028_v33 = vpop.f32.mrb[25].mxu1 }
 0x259   :  { %v1029_v35 = vadd.f32 %v2246_v30, %v1028_v33  ;;  %v1674_v23 = vpop.f32.mrb[26].mxu1 }
 0x25a   :  { %v1213_v37 = vmax.f32 %v1037_v32, 0.0  ;;  %v1040_v38 = vadd.f32 %v1674_v23, %v2246_v30  ;;  %v1031_v24 = vpop.f32.mrb[27].mxu1 }
 0x25b   :  { %v1211_v40 = vmax.f32 %v1029_v35, 0.0  ;;  %v1032_v41 = vadd.f32 %v2246_v30, %v1031_v24 }
 0x25c   :  { %v2291_v42 = vadd.f32 %v1213_v37, %v1197_v36  ;;  %v1214_v44 = vmax.f32 %v1040_v38, 0.0 }
 0x25d   :  { %v2293_v46 = vadd.f32 %v1211_v40, %v1195_v39  ;;  %v1212_v25 = vmax.f32 %v1032_v41, 0.0 }
 0x25e   :  { %v2297_v48 = vadd.f32 %v1214_v44, %v1198_v43 }
 0x25f   :  { %v2301_v51 = vadd.f32 %v1212_v25, %v1196_v45  ;;  %v1677_v52 = vpop.f32.mrb[28].mxu1 }
 0x260   :  { %v1053_v55 = vadd.f32 %v1677_v52, %v2246_v30  ;;  %v1044_v57 = vpop.f32.mrb[29].mxu1 }
 0x261   :  { %v1045_v60 = vadd.f32 %v2246_v30, %v1044_v57  ;;  %v1678_v26 = vpop.f32.mrb[30].mxu1 }
 0x262   :  { %v1217_v62 = vmax.f32 %v1053_v55, 0.0  ;;  %v1056_v63 = vadd.f32 %v1678_v26, %v2246_v30  ;;  %v1047_v27 = vpop.f32.mrb[31].mxu1 }
 0x263   :  { %v1215_v1 = vmax.f32 %v1045_v60, 0.0  ;;  %v1048_v2 = vadd.f32 %v2246_v30, %v1047_v27 }
 0x264   :  { %v2311_v28 = vadd.f32 %v1217_v62, %v1201_v61  ;;  %v1218_v4 = vmax.f32 %v1056_v63, 0.0 }
 0x265   :  { %v2313_v6 = vadd.f32 %v1215_v1, %v1199_v0  ;;  %v1216_v29 = vmax.f32 %v1048_v2, 0.0 }
 0x266   :  { %v2315_v7 = vadd.f32 %v1218_v4, %v1202_v3 }
 0x267   :  { %v2317_v8 = vadd.f32 %v1216_v29, %v1200_v5  ;;  %v1681_v9 = vpop.f32.mrb[32].mxu1 }
 0x268   :  { %v1069_v10 = vadd.f32 %v1681_v9, %v2246_v30  ;;  %v1060_v11 = vpop.f32.mrb[33].mxu1 }
 0x269   :  { %v1061_v13 = vadd.f32 %v2246_v30, %v1060_v11  ;;  %v1682_v15 = vpop.f32.mrb[34].mxu1 }
 0x26a   :  { %v1221_v17 = vmax.f32 %v1069_v10, 0.0  ;;  %v1072_v18 = vadd.f32 %v1682_v15, %v2246_v30  ;;  %v1063_v20 = vpop.f32.mrb[35].mxu1 }
 0x26b   :  { %v1219_v22 = vmax.f32 %v1061_v13, 0.0  ;;  %v1064_v31 = vadd.f32 %v2246_v30, %v1063_v20 }
 0x26c   :  { %v2324_v32 = vadd.f32 %v2256_v49, %v1221_v17  ;;  %v1222_v33 = vmax.f32 %v1072_v18, 0.0 }
 0x26d   :  { %v2327_v34 = vadd.f32 %v2258_v53, %v1219_v22  ;;  %v1220_v35 = vmax.f32 %v1064_v31, 0.0 }
 0x26e   :  { %v2330_v23 = vadd.f32 %v2261_v56, %v1222_v33 }
 0x26f   :  { %v2333_v36 = vadd.f32 %v2264_v58, %v1220_v35  ;;  %v1685_v37 = vpop.f32.mrb[36].mxu1 }
 0x270   :  { %v1085_v38 = vadd.f32 %v1685_v37, %v2246_v30  ;;  %v1076_v24 = vpop.f32.mrb[37].mxu1 }
 0x271   :  { %v1077_v39 = vadd.f32 %v2246_v30, %v1076_v24  ;;  %v1686_v40 = vpop.f32.mrb[38].mxu1 }
 0x272   :  { %v1225_v49 = vmax.f32 %v1085_v38, 0.0  ;;  %v1088_v41 = vadd.f32 %v1686_v40, %v2246_v30  ;;  %v1079_v43 = vpop.f32.mrb[39].mxu1 }
 0x273   :  { %v1223_v53 = vmax.f32 %v1077_v39, 0.0  ;;  %v1080_v44 = vadd.f32 %v2246_v30, %v1079_v43 }
 0x274   :  { %v2340_v56 = vadd.f32 %v2272_v12, %v1225_v49  ;;  %v1226_v45 = vmax.f32 %v1088_v41, 0.0 }
 0x275   :  { %v2343_v58 = vadd.f32 %v2274_v16, %v1223_v53  ;;  %v1224_v25 = vmax.f32 %v1080_v44, 0.0 }
 0x276   :  { %v2346_v47 = vadd.f32 %v2277_v19, %v1226_v45 }
 0x277   :  { %v2349_v50 = vadd.f32 %v2281_v21, %v1224_v25  ;;  %v1689_v52 = vpop.f32.mrb[40].mxu1 }
 0x278   :  { %v1101_v54 = vadd.f32 %v1689_v52, %v2246_v30  ;;  %v1092_v55 = vpop.f32.mrb[41].mxu1 }
 0x279   :  { %v1093_v57 = vadd.f32 %v2246_v30, %v1092_v55  ;;  %v1690_v59 = vpop.f32.mrb[42].mxu1 }
 0x27a   :  { %v1229_v12 = vmax.f32 %v1101_v54, 0.0  ;;  %v1104_v60 = vadd.f32 %v1690_v59, %v2246_v30  ;;  %v1095_v26 = vpop.f32.mrb[43].mxu1 }
 0x27b   :  { %v1227_v16 = vmax.f32 %v1093_v57, 0.0  ;;  %v1096_v61 = vadd.f32 %v2246_v30, %v1095_v26 }
 0x27c   :  { %v2356_v19 = vadd.f32 %v2291_v42, %v1229_v12  ;;  %v1230_v62 = vmax.f32 %v1104_v60, 0.0 }
 0x27d   :  { %v2359_v21 = vadd.f32 %v2293_v46, %v1227_v16  ;;  %v1228_v63 = vmax.f32 %v1096_v61, 0.0 }
 0x27e   :  { %v2362_v27 = vadd.f32 %v2297_v48, %v1230_v62 }
 0x27f   :  { %v2365_v0 = vadd.f32 %v2301_v51, %v1228_v63  ;;  %v1693_v1 = vpop.f32.mrb[44].mxu1 }
 0x280   :  { %v1117_v2 = vadd.f32 %v1693_v1, %v2246_v30  ;;  %v1108_v3 = vpop.f32.mrb[45].mxu1 }
 0x281   :  { %v1109_v4 = vadd.f32 %v2246_v30, %v1108_v3  ;;  %v1694_v5 = vpop.f32.mrb[46].mxu1 }
 0x282   :  { %v1233_v42 = vmax.f32 %v1117_v2, 0.0  ;;  %v1120_v29 = vadd.f32 %v1694_v5, %v2246_v30  ;;  %v1111_v9 = vpop.f32.mrb[47].mxu1 }
 0x283   :  { %v1231_v46 = vmax.f32 %v1109_v4, 0.0  ;;  %v1112_v10 = vadd.f32 %v2246_v30, %v1111_v9 }
 0x284   :  { %v2372_v48 = vadd.f32 %v2311_v28, %v1233_v42  ;;  %v1234_v11 = vmax.f32 %v1120_v29, 0.0 }
 0x285   :  { %v2375_v51 = vadd.f32 %v2313_v6, %v1231_v46  ;;  %v1232_v13 = vmax.f32 %v1112_v10, 0.0 }
 0x286   :  { %v2378_v15 = vadd.f32 %v2315_v7, %v1234_v11 }
 0x287   :  { %v2381_v17 = vadd.f32 %v2317_v8, %v1232_v13  ;;  %v1697_v18 = vpop.f32.mrb[48].mxu1 }
 0x288   :  { %v1133_v20 = vadd.f32 %v1697_v18, %v2246_v30  ;;  %v1124_v22 = vpop.f32.mrb[49].mxu1 }
 0x289   :  { %v1125_v31 = vadd.f32 %v2246_v30, %v1124_v22  ;;  %v1698_v33 = vpop.f32.mrb[50].mxu1 }
 0x28a   :  { %v1237_v28 = vmax.f32 %v1133_v20, 0.0  ;;  %v1136_v35 = vadd.f32 %v1698_v33, %v2246_v30  ;;  %v1127_v37 = vpop.f32.mrb[51].mxu1 }
 0x28b   :  { %v1235_v6 = vmax.f32 %v1125_v31, 0.0  ;;  %v1128_v38 = vadd.f32 %v2246_v30, %v1127_v37 }
 0x28c   :  { %v1285_v7 = vadd.f32 %v2324_v32, %v1237_v28  ;;  %v1238_v24 = vmax.f32 %v1136_v35, 0.0 }
 0x28d   :  { %v1283_v8 = vadd.f32 %v2327_v34, %v1235_v6  ;;  %v1236_v39 = vmax.f32 %v1128_v38, 0.0 }
 0x28e   :  { %v1286_v40 = vadd.f32 %v2330_v23, %v1238_v24 }
 0x28f   :  { %v1284_v49 = vadd.f32 %v2333_v36, %v1236_v39  ;;  %v1701_v41 = vpop.f32.mrb[52].mxu1 }
 0x290   :  { %v1750_v43 = vpack.c.bf16 %v1286_v40, %v1285_v7  ;;  %v1149_v53 = vadd.f32 %v1701_v41, %v2246_v30  ;;  %v1140_v44 = vpop.f32.mrb[53].mxu1 }
 0x291   :  { %v1747_v45 = vpack.c.bf16 %v1284_v49, %v1283_v8  ;;  %v1141_v25 = vadd.f32 %v2246_v30, %v1140_v44  ;;  %v1702_v52 = vpop.f32.mrb[54].mxu1 }
 0x292   :  { %v1241_v54 = vmax.f32 %v1149_v53, 0.0  ;;  %v1152_v32 = vadd.f32 %v1702_v52, %v2246_v30  ;;  %v1143_v55 = vpop.f32.mrb[55].mxu1 }
 0x293   :  { %v1239_v57 = vmax.f32 %v1141_v25, 0.0  ;;  %v1144_v34 = vadd.f32 %v2246_v30, %v1143_v55  ;;  %1748 = vmatpush3.bf16.xpose.msra.mxu0 %v1747_v45 }
 0x294   :  { %v1289_v23 = vadd.f32 %v2340_v56, %v1241_v54  ;;  %v1242_v36 = vmax.f32 %v1152_v32, 0.0  ;;  %1749 = vmatprep.subr.bf16.mxu0 %v1997_v14 }
 0x295   :  { %v1287_v59 = vadd.f32 %v2343_v58, %v1239_v57  ;;  %v1240_v12 = vmax.f32 %v1144_v34, 0.0 }
 0x296   :  { %v1290_v60 = vadd.f32 %v2346_v47, %v1242_v36 }
 0x297   :  { %v1288_v26 = vadd.f32 %v2349_v50, %v1240_v12  ;;  %v1705_v16 = vpop.f32.mrb[56].mxu1 }
 0x298   :  { %v1756_v61 = vpack.c.bf16 %v1290_v60, %v1289_v23  ;;  %v1165_v62 = vadd.f32 %v1705_v16, %v2246_v30  ;;  %v1156_v63 = vpop.f32.mrb[57].mxu1 }
 0x299   :  { %v1753_v1 = vpack.c.bf16 %v1288_v26, %v1287_v59  ;;  %v1157_v2 = vadd.f32 %v2246_v30, %v1156_v63  ;;  %v1706_v3 = vpop.f32.mrb[58].mxu1 }
 0x29a   :  { %v1245_v56 = vmax.f32 %v1165_v62, 0.0  ;;  %v1168_v4 = vadd.f32 %v1706_v3, %v2246_v30  ;;  %v1159_v5 = vpop.f32.mrb[59].mxu1 }
 0x29b   :  { %v1243_v42 = vmax.f32 %v1157_v2, 0.0  ;;  %v1160_v58 = vadd.f32 %v2246_v30, %v1159_v5  ;;  %1751 = vmatpush3.bf16.xpose.msra.mxu0 %v1750_v43 }
 0x29c   :  { %v1293_v47 = vadd.f32 %v2356_v19, %v1245_v56  ;;  %v1246_v50 = vmax.f32 %v1168_v4, 0.0  ;;  %1752 = vmatprep.subr.bf16.mxu0 %v1997_v14 }
 0x29d   :  { %v1291_v29 = vadd.f32 %v2359_v21, %v1243_v42  ;;  %v1244_v9 = vmax.f32 %v1160_v58, 0.0 }
 0x29e   :  { %v1294_v46 = vadd.f32 %v2362_v27, %v1246_v50 }
 0x29f   :  { %v1292_v10 = vadd.f32 %v2365_v0, %v1244_v9  ;;  %v1709_v11 = vpop.f32.mrb[60].mxu1 }
 0x2a0   :  { %v1762_v13 = vpack.c.bf16 %v1294_v46, %v1293_v47  ;;  %v1181_v18 = vadd.f32 %v1709_v11, %v2246_v30  ;;  %v1172_v20 = vpop.f32.mrb[61].mxu1 }
 0x2a1   :  { %v1759_v22 = vpack.c.bf16 %v1292_v10, %v1291_v29  ;;  %v1173_v31 = vadd.f32 %v2246_v30, %v1172_v20  ;;  %v1710_v33 = vpop.f32.mrb[62].mxu1 }
 0x2a2   :  { %v1249_v19 = vmax.f32 %v1181_v18, 0.0  ;;  %v1184_v28 = vadd.f32 %v1710_v33, %v2246_v30  ;;  %v1175_v35 = vpop.f32.mrb[63].mxu1 }
 0x2a3   :  { %v1247_v37 = vmax.f32 %v1173_v31, 0.0  ;;  %v1176_v21 = vadd.f32 %v2246_v30, %v1175_v35  ;;  %1754 = vmatpush3.bf16.xpose.msra.mxu0 %v1753_v1  ;;  %v1299_v30 = vld [vmem:[#allocation12] sm:$0xff] }
 0x2a4   :  { %v1297_v27 = vadd.f32 %v2372_v48, %v1249_v19  ;;  %v1250_v0 = vmax.f32 %v1184_v28, 0.0  ;;  %1755 = vmatprep.subr.bf16.mxu0 %v1997_v14  ;;  %v1376_v48 = vlaneseq }
 0x2a5   :  { %v1295_v6 = vadd.f32 %v2375_v51, %v1247_v37  ;;  %v1248_v38 = vmax.f32 %v1176_v21, 0.0 }
 0x2a6   :  { %v1298_v7 = vadd.f32 %v2378_v15, %v1250_v0  ;;  %v1377_v51 = vshrl.u32 %v1376_v48, 7 }
 0x2a7   :  { %v1296_v24 = vadd.f32 %v2381_v17, %v1248_v38  ;;  %v1374_v17 = vpop.permute.xlu0 %1373 }
 0x2a8   :  { %v1768_v8 = vpack.c.bf16 %v1298_v7, %v1297_v27  ;;  %v1378_v15 = vsub.s32 0, %v1377_v51 }
 0x2a9   :  { %v1765_v39 = vpack.c.bf16 %v1296_v24, %v1295_v6 }
 0x2aa   :  { %v1379_v40 = vrot.slane %v1374_v17, %v1378_v15 }
 0x2ab   :  { %1757 = vmatpush3.bf16.xpose.msra.mxu0 %v1756_v61 }
 0x2ac   :  { %1758 = vmatprep.subr.bf16.mxu0 %v1997_v14 }
 0x2b3   :  { %1760 = vmatpush3.bf16.xpose.msra.mxu0 %v1759_v22 }
 0x2b4   :  { %1761 = vmatprep.subr.bf16.mxu0 %v1997_v14 }
 0x2bb   :  { %1763 = vmatpush3.bf16.xpose.msra.mxu0 %v1762_v13 }
 0x2bc   :  { %1764 = vmatprep.subr.bf16.mxu0 %v1997_v14 }
 0x2c3   :  { %1766 = vmatpush3.bf16.xpose.msra.mxu0 %v1765_v39 }
 0x2c4   :  { %1767 = vmatprep.subr.bf16.mxu0 %v1997_v14 }
 0x2cb   :  { %1769 = vmatpush3.bf16.xpose.msra.mxu0 %v1768_v8 }
 0x2d2   :  { %1744 = vmatmul.mubr.f32.vlgmr.msra.gmra.mrb[64].mxu0 %v1299_v30 }
 0x3a5   :  { %v1366_v49 = vpop.f32.mrb[64].mxu0 }
 0x3a6   :  { %v1380_v41 = vadd.f32 %v1379_v40, %v1366_v49  ;;  %v1745_v43 = vpop.f32.mrb[65].mxu0 }
 0x3a8   :  { %1381 = vst [vmem:[#allocation14] sm:$0x1] %v1380_v41 }
 0x3a9   :  { %1968 = shalt.err (!%p1965_p10)
}
 0x3aa   :  { %s1969_s26 = scalar_lea.hbm %s2441_s7, 16 }
 0x3ab   :  { %p1970_p11 = scmp.ne.s32.totalorder %s2441_s7, %s1969_s26  ;;  %p1973_p12 = scmp.lt.u32.totalorder %s1969_s26, %s2441_s7 }
 0x3ad   :  { %p1975_p13 = pnand %p1973_p12, %p1970_p11 }
 0x3af   :  { %1978 = shalt.err (!%p1975_p13)
}
 0x3b0   :  { %1391 = dma.vmem_to_hbm [thread:$0]  %s1389_s25, 16, %s2441_s7, [#allocation5]  }
 0x3b1   :  { %1987 = dma.done.wait [#allocation5], 16  }
 0x3b2   :  { %1988 = vsyncadd [#allocation5], 4294967280 }
 0x3b3   :  { %1395 = vsyncpa [#allocation4], 1 }
 0x3b4   :  { %1396 = vsyncpa [#allocation7], 1 }
 0x3b5   :  { %1397 = vsyncpa [#allocation10], 1 }
 0x3b6   :  { %1398 = vsyncpa [#allocation13], 1 }
 0x3b7   :  { %1399 = vsyncpa [#allocation5], 1 }

</bundles_post_ra>
